<compile_context>
chip_gen: v5e
topology: v5e:2x2
jax: 0.10.0
libtpu: 0.0.40
codegen_flags: <defaults>
</compile_context>

<pallas_src>
import functools

import jax
import jax.numpy as jnp
from jax import lax
from jax.experimental import pallas as pl
from jax.experimental.pallas import tpu as pltpu

EPS = 1e-6  # CroCo/MASt3R use LayerNorm(eps=1e-6)


# ----------------------------- helpers ---------------------------------------


def _layer_norm(x, w, b):
    # f32 statistics on the VPU; w/b are (1, D) and broadcast.
    mu = jnp.mean(x, axis=-1, keepdims=True)
    var = jnp.mean((x - mu) ** 2, axis=-1, keepdims=True)
    return (x - mu) * lax.rsqrt(var + EPS) * w + b


def _largest_divisor_leq(n, cap):
    cap = max(1, min(n, cap))
    for c in range(cap, 0, -1):
        if n % c == 0:
            return c
    return 1


# ----------------------------- kernels ---------------------------------------


def _patch_embed_kernel(xp_ref, pw_ref, pb_ref, pos_ref, o_ref):
    """Patch embed (Conv2d k=s=P as matmul) + pos embed for one image."""
    tok = jnp.dot(xp_ref[...], pw_ref[...], preferred_element_type=jnp.float32)
    o_ref[...] = (tok + pb_ref[...] + pos_ref[...]).astype(o_ref.dtype)


def _encoder_kernel(tok_ref, vec_ref, qkvw_ref, qkvb_ref, projw_ref,
                    fc1w_ref, fc1b_ref, fc2w_ref, nrm_ref,
                    o_ref, acc_ref, *, num_heads):
    """All transformer blocks + final LN for one image; grid axis 1 = depth.

    o_ref (block index constant along depth) doubles as the resident bf16
    inter-layer activation; it is written back to HBM only when the batch
    index changes.  acc_ref is a single (N, D) f32 accumulator reused for the
    attention output projection and for the MLP down-projection.
    """
    d = pl.program_id(1)
    n_layers = pl.num_programs(1)

    @pl.when(d == 0)
    def _():
        o_ref[...] = tok_ref[...]

    x = o_ref[...].astype(jnp.float32)               # (N, D) residual stream (f32 in-kernel)
    N, D = x.shape
    hd = D // num_heads
    G, _, _, gw = qkvw_ref.shape                      # (groups, 3, D, group_width)
    group_heads = gw // hd
    n_chunks = fc1w_ref.shape[0]
    scale = 1.0 / (hd ** 0.5)

    # One coalesced per-layer vector block: [ln1_w|ln1_b|ln2_w|ln2_b|proj_b|fc2_b]
    vec = vec_ref[...]                                # (1, 6D) f32
    ln1_w, ln1_b = vec[:, 0:D], vec[:, D:2 * D]
    ln2_w, ln2_b = vec[:, 2 * D:3 * D], vec[:, 3 * D:4 * D]
    proj_b, fc2_b = vec[:, 4 * D:5 * D], vec[:, 5 * D:6 * D]

    # ---- multi-head self-attention (pre-norm), grouped heads ----
    h = _layer_norm(x, ln1_w, ln1_b).astype(jnp.bfloat16)
    acc_ref[...] = jnp.zeros_like(acc_ref)

    def attn_group(g, carry):
        # Dynamic index only on leading (untiled) ref dims -> no masked lane ops.
        qg = jnp.dot(h, qkvw_ref[g, 0], preferred_element_type=jnp.float32) + qkvb_ref[g, 0]
        kg = jnp.dot(h, qkvw_ref[g, 1], preferred_element_type=jnp.float32) + qkvb_ref[g, 1]
        vg = (jnp.dot(h, qkvw_ref[g, 2], preferred_element_type=jnp.float32)
              + qkvb_ref[g, 2]).astype(jnp.bfloat16)
        parts = []
        for i in range(group_heads):                  # tiny static loop (<= 4)
            lo, hi = i * hd, (i + 1) * hd
            qh = (qg[:, lo:hi] * scale).astype(jnp.bfloat16)    # scale folded into q
            kh = kg[:, lo:hi].astype(jnp.bfloat16)
            # q @ k^T without an explicit transpose (contract hd of both operands).
            s = lax.dot_general(qh, kh, (((1,), (1,)), ((), ())),
                                preferred_element_type=jnp.float32)
            s = s - jnp.max(s, axis=-1, keepdims=True)
            p = jnp.exp(s)
            p = p * pl.reciprocal(jnp.sum(p, axis=-1, keepdims=True), approx=True)
            parts.append(jnp.dot(p.astype(jnp.bfloat16), vg[:, lo:hi],
                                 preferred_element_type=jnp.float32))
        og = jnp.concatenate(parts, axis=-1).astype(jnp.bfloat16)   # (N, gw), 128/256 lanes
        # Fold the output projection into the group loop: accumulate (N,gw)@(gw,D).
        acc_ref[...] += jnp.dot(og, projw_ref[g], preferred_element_type=jnp.float32)
        return carry

    lax.fori_loop(0, G, attn_group, 0)
    x = x + acc_ref[...] + proj_b

    # ---- MLP (pre-norm), hidden dim chunked to bound the (N, Hm) intermediate ----
    h2 = _layer_norm(x, ln2_w, ln2_b).astype(jnp.bfloat16)
    acc_ref[...] = jnp.zeros_like(acc_ref)

    def mlp_chunk(c, carry):
        hcv = jnp.dot(h2, fc1w_ref[c], preferred_element_type=jnp.float32) + fc1b_ref[c]
        hcv = jax.nn.gelu(hcv, approximate=True)
        acc_ref[...] += jnp.dot(hcv.astype(jnp.bfloat16), fc2w_ref[c],
                                preferred_element_type=jnp.float32)
        return carry

    lax.fori_loop(0, n_chunks, mlp_chunk, 0)
    out = x + acc_ref[...] + fc2_b

    @pl.when(d < n_layers - 1)
    def _():
        o_ref[...] = out.astype(o_ref.dtype)

    @pl.when(d == n_layers - 1)
    def _():
        nrm = nrm_ref[...]                            # (1, 2D): [enc_norm_w | enc_norm_b]
        o_ref[...] = _layer_norm(out, nrm[:, :D], nrm[:, D:]).astype(o_ref.dtype)


# ----------------------------- wrapper ----------------------------------------


def encode_image(img, kp, *, patch_size, num_heads):
    """ViT encoder forward: patch-embed + pos-embed + depth blocks + final LN."""
    B, C, H, W = img.shape
    P = patch_size
    Gh, Gw = H // P, W // P
    N = Gh * Gw
    Pd = C * P * P
    D = kp["patch_w"].shape[1]
    L, G = kp["qkv_w"].shape[0], kp["qkv_w"].shape[1]
    gw = kp["qkv_w"].shape[4]
    nC, hc = kp["fc1_w"].shape[1], kp["fc1_w"].shape[3]
    Hm = nC * hc
    assert D % num_heads == 0 and gw * G == D and nC * hc == Hm

    # Patchify exactly like Conv2d(kernel=stride=P) + flatten(2).transpose(1,2):
    # token order row-major over (Gh, Gw); feature order (C, ph, pw).  Feed bf16.
    xp = img.reshape(B, C, Gh, P, Gw, P).transpose(0, 2, 4, 1, 3, 5).reshape(B, N, Pd)
    xp = xp.astype(jnp.bfloat16)

    # ---- stage 1: patch embed + pos embed (its own tiny pallas_call) ----
    tokens = pl.pallas_call(
        _patch_embed_kernel,
        out_shape=jax.ShapeDtypeStruct((B, N, D), jnp.bfloat16),
        grid=(B,),
        in_specs=[
            pl.BlockSpec((None, N, Pd), lambda b: (b, 0, 0)),
            pl.BlockSpec((Pd, D), lambda b: (0, 0)),
            pl.BlockSpec((1, D), lambda b: (0, 0)),
            pl.BlockSpec((N, D), lambda b: (0, 0)),
        ],
        out_specs=pl.BlockSpec((None, N, D), lambda b: (b, 0, 0)),
        compiler_params=pltpu.CompilerParams(dimension_semantics=("parallel",)),
    )(xp, kp["patch_w"], kp["patch_b"], kp["pos_embed"])

    # ---- generation-aware VMEM budget (includes softmax / MLP-chunk buffers) ----
    try:
        vmem_cap = int(pltpu.get_tpu_info().vmem_capacity_bytes)
    except Exception:
        vmem_cap = 64 << 20                                     # conservative (v7x)
    w_step = 2 * (3 * D * D + D * D + 2 * D * Hm)               # bf16 matmul weights / layer
    v_step = 4 * (6 * D + 3 * D + Hm + 2 * D)                   # f32 vectors / layer
    resident = 2 * 2 * (N * D * 2)                              # tokens in + features out (bf16)
    live = 4 * (5 * N * D                                       # x, h, residual temps (f32)
                + 3 * N * gw                                    # q/k/v group projections
                + 2 * 2 * N * N                                 # softmax s/p (~2 live heads)
                + 2 * N * hc                                    # fc1 chunk activations
                + N * D)                                        # f32 accumulator scratch
    needed = 2 * (w_step + v_step) + resident + live + (8 << 20)
    vmem_limit = int(max(32 << 20, min(needed, vmem_cap - (8 << 20))))

    kernel = functools.partial(_encoder_kernel, num_heads=num_heads)

    features = pl.pallas_call(
        kernel,
        out_shape=jax.ShapeDtypeStruct((B, N, D), jnp.bfloat16),
        grid=(B, L),
        in_specs=[
            pl.BlockSpec((None, N, D), lambda b, d: (b, 0, 0)),              # tokens (resident/b)
            pl.BlockSpec((None, 1, 6 * D), lambda b, d: (d, 0, 0)),          # packed LN/bias vecs
            pl.BlockSpec((None, G, 3, D, gw), lambda b, d: (d, 0, 0, 0, 0)),  # qkv weights (groups)
            pl.BlockSpec((None, G, 3, 1, gw), lambda b, d: (d, 0, 0, 0, 0)),  # qkv biases
            pl.BlockSpec((None, G, gw, D), lambda b, d: (d, 0, 0, 0)),        # proj weights (groups)
            pl.BlockSpec((None, nC, D, hc), lambda b, d: (d, 0, 0, 0)),       # fc1 weights (chunks)
            pl.BlockSpec((None, nC, 1, hc), lambda b, d: (d, 0, 0, 0)),       # fc1 biases
            pl.BlockSpec((None, nC, hc, D), lambda b, d: (d, 0, 0, 0)),       # fc2 weights (chunks)
            pl.BlockSpec((1, 2 * D), lambda b, d: (0, 0)),                    # final LN (w|b)
        ],
        out_specs=pl.BlockSpec((None, N, D), lambda b, d: (b, 0, 0)),
        scratch_shapes=[pltpu.VMEM((N, D), jnp.float32)],                     # shared f32 accumulator
        compiler_params=pltpu.CompilerParams(
            dimension_semantics=("parallel", "arbitrary"),
            vmem_limit_bytes=vmem_limit),
    )(tokens, kp["vecs"], kp["qkv_w"], kp["qkv_b"], kp["proj_w"],
      kp["fc1_w"], kp["fc1_b"], kp["fc2_w"], kp["enc_norm"])

    return features


def optimized_mast3r_forward(img, params, *, patch_size, num_heads):
    """Forward of the synthetic OptimizedMASt3R: encoder features [B, N, D]."""
    # TODO(synk): TensorRT engine management / host<->device buffer copies and the
    # full DUSt3R decoder + downstream heads are not representable here; the Pallas
    # kernels implement the encoder hot path that the TensorRT engine replaces.
    return encode_image(img, params, patch_size=patch_size, num_heads=num_heads)


# -------------------------- parameters ----------------------------------------


def init_params(key, *, in_chans, patch_size, embed_dim, depth, mlp_ratio, num_tokens):
    """Natural (PyTorch-like, depth-stacked) f32 parameters."""
    Pd = in_chans * patch_size * patch_size
    D = embed_dim
    Hm = int(mlp_ratio * D)
    ks = jax.random.split(key, 6)
    s = 0.02

    def nrm(k, shape):
        return s * jax.random.normal(k, shape, jnp.float32)

    return {
        "patch_w": nrm(ks[0], (Pd, D)),
        "patch_b": jnp.zeros((1, D), jnp.float32),
        "pos_embed": nrm(ks[1], (num_tokens, D)),
        "enc_norm_w": jnp.ones((D,), jnp.float32),
        "enc_norm_b": jnp.zeros((D,), jnp.float32),
        "ln1_w": jnp.ones((depth, D), jnp.float32),
        "ln1_b": jnp.zeros((depth, D), jnp.float32),
        "ln2_w": jnp.ones((depth, D), jnp.float32),
        "ln2_b": jnp.zeros((depth, D), jnp.float32),
        "qkv_w": nrm(ks[2], (depth, D, 3 * D)),
        "qkv_b": jnp.zeros((depth, 3 * D), jnp.float32),
        "proj_w": nrm(ks[3], (depth, D, D)),
        "proj_b": jnp.zeros((depth, D), jnp.float32),
        "fc1_w": nrm(ks[4], (depth, D, Hm)),
        "fc1_b": jnp.zeros((depth, Hm), jnp.float32),
        "fc2_w": nrm(ks[5], (depth, Hm, D)),
        "fc2_b": jnp.zeros((depth, D), jnp.float32),
    }


def pack_params(p, *, num_heads):
    """Reorganize natural params into the kernel layout (head groups / MLP chunks),
    matmul weights in bf16, LayerNorm/bias vectors coalesced."""
    L, D, _ = p["qkv_w"].shape
    Hm = p["fc1_w"].shape[2]
    assert D % num_heads == 0
    hd = D // num_heads
    gh = _largest_divisor_leq(num_heads, max(1, 256 // hd))   # heads per group (<=256 lanes)
    gw = gh * hd
    G = num_heads // gh
    hc = _largest_divisor_leq(Hm, 512)                        # MLP hidden chunk width
    nC = Hm // hc
    wdt = jnp.bfloat16

    qkv_w = p["qkv_w"].reshape(L, D, 3, G, gw).transpose(0, 3, 2, 1, 4).astype(wdt)
    qkv_b = (p["qkv_b"].reshape(L, 3, G, gw).transpose(0, 2, 1, 3)
             .reshape(L, G, 3, 1, gw).astype(jnp.float32))
    proj_w = p["proj_w"].reshape(L, G, gw, D).astype(wdt)
    fc1_w = p["fc1_w"].reshape(L, D, nC, hc).transpose(0, 2, 1, 3).astype(wdt)
    fc1_b = p["fc1_b"].reshape(L, nC, 1, hc).astype(jnp.float32)
    fc2_w = p["fc2_w"].reshape(L, nC, hc, D).astype(wdt)
    vecs = jnp.concatenate(
        [p["ln1_w"], p["ln1_b"], p["ln2_w"], p["ln2_b"], p["proj_b"], p["fc2_b"]],
        axis=-1).reshape(L, 1, 6 * D).astype(jnp.float32)
    enc_norm = jnp.concatenate([p["enc_norm_w"], p["enc_norm_b"]]).reshape(1, 2 * D)

    return {
        "patch_w": p["patch_w"].astype(wdt),
        "patch_b": p["patch_b"].astype(jnp.float32),
        "pos_embed": p["pos_embed"].astype(jnp.float32),
        "vecs": vecs,
        "qkv_w": qkv_w, "qkv_b": qkv_b,
        "proj_w": proj_w,
        "fc1_w": fc1_w, "fc1_b": fc1_b, "fc2_w": fc2_w,
        "enc_norm": enc_norm.astype(jnp.float32),
    }


# -------------------------- pure-JAX reference --------------------------------


def reference_encode(img, p, *, patch_size, num_heads):
    B, C, H, W = img.shape
    P = patch_size
    Gh, Gw = H // P, W // P
    N = Gh * Gw
    D = p["patch_w"].shape[1]
    hd = D // num_heads

    def ln(x, w, b):
        mu = x.mean(-1, keepdims=True)
        var = ((x - mu) ** 2).mean(-1, keepdims=True)
        return (x - mu) * lax.rsqrt(var + EPS) * w + b

    xp = img.reshape(B, C, Gh, P, Gw, P).transpose(0, 2, 4, 1, 3, 5).reshape(B, N, -1)
    x = xp @ p["patch_w"] + p["patch_b"] + p["pos_embed"]
    L = p["qkv_w"].shape[0]
    for l in range(L):
        h = ln(x, p["ln1_w"][l], p["ln1_b"][l])
        qkv = h @ p["qkv_w"][l] + p["qkv_b"][l]
        q, k, v = qkv[..., :D], qkv[..., D:2 * D], qkv[..., 2 * D:]
        q = q.reshape(B, N, num_heads, hd).transpose(0, 2, 1, 3)
        k = k.reshape(B, N, num_heads, hd).transpose(0, 2, 1, 3)
        v = v.reshape(B, N, num_heads, hd).transpose(0, 2, 1, 3)
        s = jnp.einsum("bhqd,bhkd->bhqk", q, k) / (hd ** 0.5)
        a = jax.nn.softmax(s, axis=-1)
        o = jnp.einsum("bhqk,bhkd->bhqd", a, v).transpose(0, 2, 1, 3).reshape(B, N, D)
        x = x + o @ p["proj_w"][l] + p["proj_b"][l]
        h = ln(x, p["ln2_w"][l], p["ln2_b"][l])
        h = jax.nn.gelu(h @ p["fc1_w"][l] + p["fc1_b"][l], approximate=True)
        x = x + h @ p["fc2_w"][l] + p["fc2_b"][l]
    return ln(x, p["enc_norm_w"], p["enc_norm_b"])


# ------------------------------- main ------------------------------------------


if __name__ == "__main__":
    B, C, H, W = 2, 3, 32, 32
    PATCH = 8
    EMBED = 512          # 8 heads x head_dim 64 -> 2 head-groups of 256 lanes
    DEPTH = 2
    HEADS = 8
    MLP_RATIO = 4.0
    N_TOKENS = (H // PATCH) * (W // PATCH)

    root = jax.random.PRNGKey(0)
    k_img, k_par = jax.random.split(root)
    img = jax.random.normal(k_img, (B, C, H, W), jnp.float32)
    natural = init_params(k_par, in_chans=C, patch_size=PATCH, embed_dim=EMBED,
                          depth=DEPTH, mlp_ratio=MLP_RATIO, num_tokens=N_TOKENS)
    params = pack_params(natural, num_heads=HEADS)

    feats = optimized_mast3r_forward(img, params, patch_size=PATCH, num_heads=HEADS)
    feats = jax.block_until_ready(feats)
    assert feats.shape == (B, N_TOKENS, EMBED), feats.shape
    feats_f32 = feats.astype(jnp.float32)
    assert bool(jnp.all(jnp.isfinite(feats_f32)))

    ref = reference_encode(img, natural, patch_size=PATCH, num_heads=HEADS)
    err = float(jnp.max(jnp.abs(feats_f32 - ref)))
    assert err < 0.25, f"max abs error vs f32 reference too large: {err}"

    print("KERNEL_OK")
</pallas_src>

<mosaic_0001>
module attributes {stable_mosaic.version = 11 : i64} {
  func.func @_patch_embed_kernel(%arg0: i32, %arg1: memref<1x16x192xbf16, #tpu.memory_space<vmem>>, %arg2: memref<192x512xbf16, #tpu.memory_space<vmem>>, %arg3: memref<1x512xf32, #tpu.memory_space<vmem>>, %arg4: memref<16x512xf32, #tpu.memory_space<vmem>>, %arg5: memref<1x16x512xbf16, #tpu.memory_space<vmem>>) attributes {dimension_semantics = [#tpu.dimension_semantics<parallel>], iteration_bounds = array<i64: 2>, scalar_prefetch = 0 : i64, scratch_operands = 0 : i64, tpu.core_type = #tpu.core_type<tc>, window_params = [{transform_indices = @transform_0, window_bounds = array<i64: 1, 16, 192>}, {pipeline_mode = #tpu.pipeline_mode<synchronous>, transform_indices = @transform_1, window_bounds = array<i64: 192, 512>}, {pipeline_mode = #tpu.pipeline_mode<synchronous>, transform_indices = @transform_2, window_bounds = array<i64: 1, 512>}, {pipeline_mode = #tpu.pipeline_mode<synchronous>, transform_indices = @transform_3, window_bounds = array<i64: 16, 512>}, {transform_indices = @transform_4, window_bounds = array<i64: 1, 16, 512>}]} {
    %c0 = arith.constant 0 : index
    %c0_0 = arith.constant 0 : index
    %c0_1 = arith.constant 0 : index
    %0 = vector.load %arg1[%c0, %c0_0, %c0_1] : memref<1x16x192xbf16, #tpu.memory_space<vmem>>, vector<1x16x192xbf16>
    %1 = vector.shape_cast %0 : vector<1x16x192xbf16> to vector<16x192xbf16>
    %c0_2 = arith.constant 0 : index
    %c0_3 = arith.constant 0 : index
    %2 = vector.load %arg2[%c0_2, %c0_3] : memref<192x512xbf16, #tpu.memory_space<vmem>>, vector<192x512xbf16>
    %cst = arith.constant dense<0.000000e+00> : vector<16x512xf32>
    %3 = tpu.matmul %1, %2, %cst {dimension_numbers = #tpu.dot_dimension_numbers<[1], [0], [0], [1], [0, 0, 1, 1], [], []>} : vector<16x192xbf16>, vector<192x512xbf16>, vector<16x512xf32> -> vector<16x512xf32>
    %c0_4 = arith.constant 0 : index
    %c0_5 = arith.constant 0 : index
    %4 = vector.load %arg3[%c0_4, %c0_5] : memref<1x512xf32, #tpu.memory_space<vmem>>, vector<1x512xf32>
    %5 = vector.broadcast %4 : vector<1x512xf32> to vector<16x512xf32>
    %6 = arith.addf %3, %5 : vector<16x512xf32>
    %c0_6 = arith.constant 0 : index
    %c0_7 = arith.constant 0 : index
    %7 = vector.load %arg4[%c0_6, %c0_7] : memref<16x512xf32, #tpu.memory_space<vmem>>, vector<16x512xf32>
    %8 = arith.addf %6, %7 : vector<16x512xf32>
    %9 = arith.truncf %8 : vector<16x512xf32> to vector<16x512xbf16>
    %c0_8 = arith.constant 0 : index
    %c0_9 = arith.constant 0 : index
    %c0_10 = arith.constant 0 : index
    %10 = vector.load %arg5[%c0_8, %c0_9, %c0_10] : memref<1x16x512xbf16, #tpu.memory_space<vmem>>, vector<1x16x512xbf16>
    %11 = vector.shape_cast %10 : vector<1x16x512xbf16> to vector<16x512xbf16>
    %12 = vector.shape_cast %9 : vector<16x512xbf16> to vector<1x16x512xbf16>
    tpu.vector_store %arg5[%c0_8, %c0_9, %c0_10], %12 {strides = array<i32>} : memref<1x16x512xbf16, #tpu.memory_space<vmem>>, vector<1x16x512xbf16>,
    return
  }
  func.func @transform_0(%arg0: i32) -> (i32, i32, i32) {
    %c0_i32 = arith.constant 0 : i32
    %c0_i32_0 = arith.constant 0 : i32
    %c0_i32_1 = arith.constant 0 : i32
    return %arg0, %c0_i32, %c0_i32_0 : i32, i32, i32
  }
  func.func @transform_1(%arg0: i32) -> (i32, i32) {
    %c0_i32 = arith.constant 0 : i32
    %c0_i32_0 = arith.constant 0 : i32
    %c0_i32_1 = arith.constant 0 : i32
    return %c0_i32, %c0_i32_0 : i32, i32
  }
  func.func @transform_2(%arg0: i32) -> (i32, i32) {
    %c0_i32 = arith.constant 0 : i32
    %c0_i32_0 = arith.constant 0 : i32
    %c0_i32_1 = arith.constant 0 : i32
    return %c0_i32, %c0_i32_0 : i32, i32
  }
  func.func @transform_3(%arg0: i32) -> (i32, i32) {
    %c0_i32 = arith.constant 0 : i32
    %c0_i32_0 = arith.constant 0 : i32
    %c0_i32_1 = arith.constant 0 : i32
    return %c0_i32, %c0_i32_0 : i32, i32
  }
  func.func @transform_4(%arg0: i32) -> (i32, i32, i32) {
    %c0_i32 = arith.constant 0 : i32
    %c0_i32_0 = arith.constant 0 : i32
    %c0_i32_1 = arith.constant 0 : i32
    return %arg0, %c0_i32, %c0_i32_0 : i32, i32, i32
  }
}

</mosaic_0001>

<bundles_post_ra>
// kernel: tpu_custom_call.1
= control target key start
LH: loop header
LB: loop body
LE: loop exit
PB: predicated region body
PF: predicated region fallthrough
CT: control target
= control target key end

     0   :  { %9 = vsyncpa [#allocation3], 0  ;;  %s1611_s0 = inlined_call_operand.hbm [shape: bf16[2,16,192], index: 0, kind: input, shape index: {}]   ;;  %s1612_s1 = inlined_call_operand.hbm [shape: bf16[192,512], index: 1, kind: input, shape index: {}]   ;;  %s1613_s2 = inlined_call_operand.hbm [shape: f32[1,512], index: 2, kind: input, shape index: {}]   ;;  %s1614_s3 = inlined_call_operand.hbm [shape: f32[16,512], index: 3, kind: input, shape index: {}]   ;;  %s1615_s4 = inlined_call_operand.hbm [shape: bf16[2,16,512], index: 4, kind: output, shape index: {}]  }
   0x1   :  { %11 = vsyncpa [#allocation3 + $0x1], 0 }
   0x2   :  { %12 = vsyncpa [#allocation6], 0 }
   0x3   :  { %13 = vsyncpa [#allocation9], 0 }
   0x4   :  { %14 = vsyncpa [#allocation4], 0 }
   0x5   :  { %16 = vsyncpa [#allocation4 + $0x1], 0  ;;  %s1427_s15 = smov 0   ;;  %s1429_s16 = smov 0  }
   0x6   :  { %s1431_s17 = smov 0   ;;  %s1433_s18 = smov 0  }
   0x7 LB: > { %s1448_s19 = sadd.s32 4294967295, %s1389_s18   ;;  %s834_s20 = sadd.s32 4294967294, %s1389_s18   ;;  %s1389_s18 = sphi %s1433_s18, %s1626_s18   ;;  %s1385_s17 = sphi %s1431_s17, %s1625_s17   ;;  %s1381_s16 = sphi %s1429_s16, %s1624_s16   ;;  %s1377_s15 = sphi %s1427_s15, %s1623_s15  }
   0x8   : > { %p42_p0 = scmp.ne.s32.totalorder %s1381_s16, %s1377_s15  ;;  %p43_p1 = scmp.eq.s32.totalorder %s1448_s19, 0 }
   0x9   : > { %p129_p2 = scmp.eq.s32.totalorder %s1448_s19, 1  ;;  %p135_p3 = scmp.eq.s32.totalorder %s834_s20, 1 }
   0xa   : > { %p1457_p4 = por %p43_p1, %p42_p0  ;;  %p835_p5 = scmp.ge.s32.totalorder %s1389_s18, 1 }
   0xb   : > { %p1462_p6 = por %p135_p3, %p42_p0  ;;  %p142_p7 = scmp.lt.s32.totalorder %s1389_s18, 3 }
   0xc   : > { %s153_s25 = sshll.u32 %s1612_s1, 4  ;;  %s1391_s27 = smov [#allocation5]   ;;  %s154_s25 = int_to_ptr.hbm [resolvable:$true] %s153_s25 }
   0xd   : > { %p1470_p8 = pnand %p835_p5, %p142_p7  ;;  %s155_s28 = sshll.u32 %s1391_s27, 4  ;;  %s156_s28 = int_to_ptr.vmem [resolvable:$true] %s155_s28 }
   0xe   : > { %s168_s6 = sshll.u32 %s1613_s2, 4  ;;  %s1392_s7 = smov 256   ;;  %s169_s6 = int_to_ptr.hbm [resolvable:$true] %s168_s6 }
   0xf   : > { %p1126_p9 = pneg %p1470_p8  ;;  %s1393_s8 = smov 16  }
  0x10   : > { %s1394_s9 = smov [#allocation7]   ;;  %s179_s13 = sshll.u32 %s1614_s3, 4  ;;  %s180_s13 = int_to_ptr.hbm [resolvable:$true] %s179_s13 }
  0x11   : > { %p1478_p10 = pnand %p1126_p9, %p43_p1  ;;  %s170_s10 = sshll.u32 %s1394_s9, 4  ;;  %s171_s10 = int_to_ptr.vmem [resolvable:$true] %s170_s10 }
  0x12   : > { %s1395_s14 = smov [#allocation8]   ;;  %s1396_s23 = smov 512  }
  0x13   : > { %1129 = dma.hbm_to_vmem [thread:$0]  (!%p1478_p10), %s154_s25, 6144, %s156_s28, [#allocation6], %s1392_s7, %s1392_s7, %s1393_s8  }
  0x14   : > { %1132 = dma.hbm_to_vmem [thread:$0]  (!%p1478_p10), %s169_s6, 64, %s171_s10, [#allocation6]  }
  0x15   : > { %s181_s20 = sshll.u32 %s1395_s14, 4  ;;  %s1397_s24 = smov 32   ;;  %s182_s20 = int_to_ptr.vmem [resolvable:$true] %s181_s20 }
  0x16   : > { %1135 = dma.hbm_to_vmem [thread:$0]  (!%p1478_p10), %s180_s13, 1024, %s182_s20, [#allocation9], %s1396_s23, %s1396_s23, %s1397_s24  }
  0x17   : > { %s1496_s25 = sadd.s32 1, %s1389_s18   ;;  %s29_s28 = sadd.s32 1, %s1385_s17 }
  0x18   : > { %s26_s27 = ssub.s32 %s1389_s18, %s1496_s25  ;;  %p36_p13 = scmp.ne.s32.totalorder %s1385_s17, %s1381_s16 }
  0x19   : > { %p27_p12 = scmp.eq.s32.totalorder %s26_s27, 0  ;;  %p37_p0 = scmp.eq.s32.totalorder %s1389_s18, 0 }
  0x1a   : > { %p1147_p3 = scmp.lt.s32.totalorder %s1389_s18, 2  ;;  %p1510_p7 = por %p129_p2, %p36_p13 }
  0x1b   : > { %s1506_s30 = scalar_select %p27_p12, %s1385_s17, %s29_s28  }
  0x1c   : > { %p38_p5 = por %p37_p0, %p36_p13  ;;  %s195_s29 = sand.u32 1, %s1385_s17  }
  0x1d   : > { %s1058_s6 = sshll.u32 %s1389_s18, 4  ;;  %s840_s7 = sshll.u32 %s195_s29, 4 }
  0x1e   : > { %s204_s10 = scalar_lea.hbm %s1611_s0, %s1058_s6  ;;  %s199_s12 = scalar_lea.vmem [#allocation2], %s840_s7 }
  0x1f   : > { %s205_s11 = sshll.u32 %s204_s10, 4  ;;  %s207_s13 = sshll.u32 %s199_s12, 4  ;;  %s206_s11 = int_to_ptr.hbm [resolvable:$true] %s205_s11  ;;  %s208_s13 = int_to_ptr.vmem [resolvable:$true] %s207_s13 }
  0x20   : > { %p1521_p9 = pnand %p1147_p3, %p38_p5  ;;  %s196_s20 = scalar_lea.sflag [#allocation3], %s195_s29 }
  0x21   : > { %s1285_s23 = sshra.s32 %s206_s11, 4  ;;  %s1292_s6 = scalar_lea.hbm %s1611_s0, 32  ;;  %s1286_s23 = int_to_ptr.hbm [resolvable:$true] %s1285_s23 }
  0x22   : > { %s1287_s24 = scalar_lea.hbm %s1286_s23, 16  ;;  %p1289_p10 = pneg %p1521_p9 }
  0x23   : > { %p1288_p2 = scmp.ne.s32.totalorder %s1286_s23, %s1287_s24  ;;  %p1293_p0 = scmp.lt.s32.totalorder %s1286_s23, %s1611_s0 }
  0x24   : > { %p1294_p3 = scmp.lt.s32.totalorder %s1292_s6, %s1287_s24 }
  0x25   : > { %p1290_p12 = pnand %p1289_p10, %p1288_p2 }
  0x26   : > { %p1295_p5 = por %p1294_p3, %p1293_p0 }
  0x27   : > { %p1291_p13 = pneg %p1290_p12 }
  0x29   : > { %p1296_p11 = pnand %p1295_p5, %p1291_p13 }
  0x2b   : > { %1299 = shalt.err (!%p1296_p11)
}
  0x2c   : > { %s1398_s29 = smov 128   ;;  %s1399_s9 = smov 8  }
  0x2d   : > { %1139 = dma.hbm_to_vmem [thread:$0]  (!%p1521_p9), %s206_s11, 256, %s208_s13, %s196_s20, %s1398_s29, %s1398_s29, %s1399_s9  }
  0x2e   : > { %219 = sbr.rel (%p1470_p8) target bundleno = 268 (0x10c), region = 36  ;;  %s1538_s10 = sand.u32 (!%p1470_p8), 1, %s1381_s16  }
  0x2f   : > { %s844_s12 = sshll.u32 (!%p1470_p8), %s1538_s10, 4  ;;  %s222_s23 = scalar_lea.sflag (!%p1470_p8), [#allocation3], %s1538_s10 }
  0x30   : > { %s1542_s24 = scalar_lea.vmem (!%p1470_p8), [#allocation2], %s844_s12 }
  0x33   : > { %1360 = dma.done.wait (%p1457_p4), %s222_s23, 256  }
  0x34   : > { %1362 = vsyncadd (%p1457_p4), %s222_s23, 4294967040 }
  0x35   : > { %1364 = dma.done.wait (%p43_p1), [#allocation6], 6208  }
  0x36   : > { %1366 = vsyncadd (%p43_p1), [#allocation6], 4294961088 }
  0x37   : > { %1368 = dma.done.wait (%p43_p1), [#allocation9], 1024  }
  0x38   : > { %1370 = vsyncadd (%p43_p1), [#allocation9], 4294966272  ;;  %v971_v0 = vld [vmem:[#allocation5 + $0xe0] sm:$0xf]  ;;  %v1091_v1 = vld [vmem:[#allocation5 + $0xec] sm:$0xf0] }
  0x39   : > { %v1089_v2 = vld [vmem:[#allocation5 + $0xe4] sm:$0xf]  ;;  %v972_v3 = vor.u32 %v1091_v1, %v971_v0  ;;  %v973_v4 = vld [vmem:[#allocation5 + $0xf0] sm:$0xf0]  ;;  %v955_v5 = vld [vmem:[#allocation5 + $0xc0] sm:$0xf] }
  0x3a   : > { %v1087_v6 = vld [vmem:[#allocation5 + $0xcc] sm:$0xf0]  ;;  %v976_v7 = vor.u32 %v1089_v2, %v973_v4  ;;  %v1085_v8 = vld [vmem:[#allocation5 + $0xc4] sm:$0xf]  ;;  %v957_v9 = vld [vmem:[#allocation5 + $0xd0] sm:$0xf0] }
  0x3b   : > { %580 = vmatpush.bf16.msra.mxu0 %v972_v3  ;;  %v956_v10 = vor.u32 %v1087_v6, %v955_v5  ;;  %v1035_v11 = vld [vmem:[#allocation5 + $0x160] sm:$0xf]  ;;  %v1107_v12 = vld [vmem:[#allocation5 + $0x16c] sm:$0xf0]  ;;  %v960_v13 = vor.u32 %v1085_v8, %v957_v9  ;;  %v1081_v17 = vld [vmem:[#allocation5 + $0xa4] sm:$0xf] }
  0x3c   : > { %608 = vmatpush.bf16.msra.mxu2 %v976_v7  ;;  %v939_v14 = vld [vmem:[#allocation5 + $0xa0] sm:$0xf]  ;;  %v1083_v15 = vld [vmem:[#allocation5 + $0xac] sm:$0xf0]  ;;  %v1036_v16 = vor.u32 %v1107_v12, %v1035_v11  ;;  %v941_v18 = vld [vmem:[#allocation5 + $0xb0] sm:$0xf0] }
  0x3d   : > { %v1019_v19 = vld [vmem:[#allocation5 + $0x140] sm:$0xf]  ;;  %v1103_v20 = vld [vmem:[#allocation5 + $0x14c] sm:$0xf0]  ;;  %v940_v22 = vor.u32 %v1083_v15, %v939_v14  ;;  %v944_v25 = vor.u32 %v1081_v17, %v941_v18  ;;  %v1105_v28 = vld [vmem:[#allocation5 + $0x164] sm:$0xf] }
  0x3e   : > { %598 = vmatpush.bf16.msra.mxu1 %v1036_v16  ;;  %v1020_v21 = vor.u32 %v1103_v20, %v1019_v19  ;;  %v1003_v23 = vld [vmem:[#allocation5 + $0x120] sm:$0xf]  ;;  %v1099_v24 = vld [vmem:[#allocation5 + $0x12c] sm:$0xf0]  ;;  %v1077_v29 = vld [vmem:[#allocation5 + $0x84] sm:$0xf] }
  0x3f   : > { %581 = vmatpush.bf16.msra.mxu0 %v956_v10  ;;  %v923_v26 = vld [vmem:[#allocation5 + $0x80] sm:$0xf]  ;;  %v1079_v27 = vld [vmem:[#allocation5 + $0x8c] sm:$0xf0]  ;;  %v925_v30 = vld [vmem:[#allocation5 + $0x90] sm:$0xf0]  ;;  %v1004_v33 = vor.u32 %v1099_v24, %v1003_v23 }
  0x40   : > { %609 = vmatpush.bf16.msra.mxu2 %v960_v13  ;;  %v1037_v31 = vld [vmem:[#allocation5 + $0x170] sm:$0xf0]  ;;  %v907_v32 = vld [vmem:[#allocation5 + $0x60] sm:$0xf]  ;;  %v924_v36 = vor.u32 %v1079_v27, %v923_v26  ;;  %v1095_v37 = vld [vmem:[#allocation5 + $0x10c] sm:$0xf0]  ;;  %v928_v40 = vor.u32 %v1077_v29, %v925_v30 }
  0x41   : > { %v1040_v34 = vor.u32 %v1105_v28, %v1037_v31  ;;  %v987_v35 = vld [vmem:[#allocation5 + $0x100] sm:$0xf]  ;;  %v1101_v38 = vld [vmem:[#allocation5 + $0x144] sm:$0xf]  ;;  %v1021_v39 = vld [vmem:[#allocation5 + $0x150] sm:$0xf0] }
  0x42   : > { %599 = vmatpush.bf16.msra.mxu1 %v1020_v21  ;;  %v1075_v41 = vld [vmem:[#allocation5 + $0x6c] sm:$0xf0]  ;;  %v1024_v42 = vor.u32 %v1101_v38, %v1021_v39  ;;  %v979_v43 = vld [vmem:[#allocation5 + $0xe8] sm:$0xf]  ;;  %v1092_v44 = vld [vmem:[#allocation5 + $0xf4] sm:$0xf0]  ;;  %v988_v47 = vor.u32 %v1095_v37, %v987_v35 }
  0x43   : > { %582 = vmatpush.bf16.msra.mxu0 %v940_v22  ;;  %626 = vmatpush.bf16.msra.mxu3 %v1040_v34  ;;  %v1073_v45 = vld [vmem:[#allocation5 + $0x64] sm:$0xf]  ;;  %v909_v46 = vld [vmem:[#allocation5 + $0x70] sm:$0xf0]  ;;  %v908_v50 = vor.u32 %v1075_v41, %v907_v32  ;;  %v891_v51 = vld [vmem:[#allocation5 + $0x40] sm:$0xf]  ;;  %v980_v53 = vor.u32 %v1092_v44, %v979_v43 }
  0x44   : > { %610 = vmatpush.bf16.msra.mxu2 %v944_v25  ;;  %v1097_v48 = vld [vmem:[#allocation5 + $0x124] sm:$0xf]  ;;  %v1005_v49 = vld [vmem:[#allocation5 + $0x130] sm:$0xf0]  ;;  %v1071_v52 = vld [vmem:[#allocation5 + $0x4c] sm:$0xf0]  ;;  %v912_v54 = vor.u32 %v1073_v45, %v909_v46 }
  0x45   : > { %v1069_v55 = vld [vmem:[#allocation5 + $0x44] sm:$0xf]  ;;  %v1008_v56 = vor.u32 %v1097_v48, %v1005_v49  ;;  %v963_v57 = vld [vmem:[#allocation5 + $0xc8] sm:$0xf]  ;;  %v1088_v58 = vld [vmem:[#allocation5 + $0xd4] sm:$0xf0]  ;;  %v892_v0 = vor.u32 %v1071_v52, %v891_v51 }
  0x46   : > { %600 = vmatpush.bf16.msra.mxu1 %v1004_v33  ;;  %v893_v59 = vld [vmem:[#allocation5 + $0x50] sm:$0xf0]  ;;  %v1093_v60 = vld [vmem:[#allocation5 + $0x104] sm:$0xf]  ;;  %v875_v62 = vld [vmem:[#allocation5 + $0x20] sm:$0xf]  ;;  %v964_v2 = vor.u32 %v1088_v58, %v963_v57 }
  0x47   : > { %583 = vmatpush.bf16.msra.mxu0 %v924_v36  ;;  %627 = vmatpush.bf16.msra.mxu3 %v1024_v42  ;;  %v989_v61 = vld [vmem:[#allocation5 + $0x110] sm:$0xf0]  ;;  %v1067_v63 = vld [vmem:[#allocation5 + $0x2c] sm:$0xf0]  ;;  %v1065_v1 = vld [vmem:[#allocation5 + $0x24] sm:$0xf]  ;;  %v896_v5 = vor.u32 %v1069_v55, %v893_v59 }
  0x48   : > { %611 = vmatpush.bf16.msra.mxu2 %v928_v40  ;;  %v1059_v3 = vld [vmem:[%s1542_s24 + $0x4] sm:$0xf]  ;;  %v853_v4 = vld [vmem:[%s1542_s24 + $0x8] sm:$0xf0]  ;;  %v992_v7 = vor.u32 %v1093_v60, %v989_v61  ;;  %v947_v8 = vld [vmem:[#allocation5 + $0xa8] sm:$0xf]  ;;  %v876_v16 = vor.u32 %v1067_v63, %v875_v62 }
  0x49   : > { %v877_v6 = vld [vmem:[#allocation5 + $0x30] sm:$0xf0]  ;;  %v1084_v9 = vld [vmem:[#allocation5 + $0xb4] sm:$0xf0]  ;;  %v1558_v10 = vor.u32 %v1059_v3, %v853_v4  ;;  %vm576_vm0 = vcmask 523264   ;;  %s848_s21 = sshll.u32 %s1538_s10, 5 }
  0x4a   : > { %601 = vmatpush.bf16.msra.mxu1 %v988_v47  ;;  %v1043_v11 = vld [vmem:[#allocation5 + $0x168] sm:$0xf]  ;;  %v1108_v12 = vld [vmem:[#allocation5 + $0x174] sm:$0xf0]  ;;  %v859_v13 = vld [vmem:[#allocation5] sm:$0xf]  ;;  %v948_v19 = vor.u32 %v1084_v9, %v947_v8  ;;  %v880_v21 = vor.u32 %v1065_v1, %v877_v6 }
  0x4b   : > { %584 = vmatpush.bf16.msra.mxu0 %v908_v50  ;;  %628 = vmatpush.bf16.msra.mxu3 %v1008_v56  ;;  %v1063_v14 = vld [vmem:[#allocation5 + $0xc] sm:$0xf0]  ;;  %v1044_v15 = vor.u32 %v1108_v12, %v1043_v11  ;;  %v1061_v17 = vld [vmem:[#allocation5 + $0x4] sm:$0xf]  ;;  %v861_v18 = vld [vmem:[#allocation5 + $0x10] sm:$0xf0] }
  0x4c   : > { %612 = vmatpush.bf16.msra.mxu2 %v912_v54  ;;  %v1027_v20 = vld [vmem:[#allocation5 + $0x148] sm:$0xf]  ;;  %v1080_v23 = vld [vmem:[#allocation5 + $0x94] sm:$0xf0]  ;;  %v1090_v25 = vld [vmem:[#allocation5 + $0xec] sm:$0xf]  ;;  %v860_v32 = vor.u32 %v1063_v14, %v859_v13  ;;  %v864_v35 = vor.u32 %v1061_v17, %v861_v18 }
  0x4d   : > { %1049 = vmatmul.msk.bf16.vlgmr.msra.gmra.mxu1 %vm576_vm0, %v1558_v10  ;;  %v931_v22 = vld [vmem:[#allocation5 + $0x88] sm:$0xf]  ;;  %v1104_v24 = vld [vmem:[#allocation5 + $0x154] sm:$0xf0]  ;;  %v981_v26 = vld [vmem:[#allocation5 + $0xf8] sm:$0xf0] }
  0x4e   : > { %636 = vmatpush.bf16.msrb.mxu1 %v980_v53  ;;  %v1106_v27 = vld [vmem:[#allocation5 + $0x16c] sm:$0xf]  ;;  %v1028_v28 = vor.u32 %v1104_v24, %v1027_v20  ;;  %v1045_v29 = vld [vmem:[#allocation5 + $0x178] sm:$0xf0]  ;;  %v1011_v30 = vld [vmem:[#allocation5 + $0x128] sm:$0xf]  ;;  %v932_v34 = vor.u32 %v1080_v23, %v931_v22  ;;  %v984_v36 = vor.u32 %v1090_v25, %v981_v26 }
  0x4f   : > { %585 = vmatpush.bf16.msra.mxu0 %v892_v0  ;;  %629 = vmatpush.bf16.msra.mxu3 %v992_v7  ;;  %v1100_v31 = vld [vmem:[#allocation5 + $0x134] sm:$0xf0]  ;;  %v851_v33 = vld [vmem:[%s1542_s24] sm:$0xf]  ;;  %v915_v38 = vld [vmem:[#allocation5 + $0x68] sm:$0xf]  ;;  %v1048_v42 = vor.u32 %v1106_v27, %v1045_v29 }
  0x50   : > { %613 = vmatpush.bf16.msra.mxu2 %v896_v5  ;;  %v1060_v37 = vld [vmem:[%s1542_s24 + $0x4] sm:$0xf0]  ;;  %v1086_v40 = vld [vmem:[#allocation5 + $0xcc] sm:$0xf]  ;;  %v965_v41 = vld [vmem:[#allocation5 + $0xd8] sm:$0xf0]  ;;  %v1012_v44 = vor.u32 %v1100_v31, %v1011_v30 }
  0x51   : > { %v1076_v39 = vld [vmem:[#allocation5 + $0x74] sm:$0xf0]  ;;  %v1102_v43 = vld [vmem:[#allocation5 + $0x14c] sm:$0xf]  ;;  %v1029_v45 = vld [vmem:[#allocation5 + $0x158] sm:$0xf0]  ;;  %v852_v48 = vor.u32 %v1060_v37, %v851_v33  ;;  %v968_v50 = vor.u32 %v1086_v40, %v965_v41 }
  0x52   : > { %637 = vmatpush.bf16.msrb.mxu1 %v964_v2  ;;  %1050 = vmatmul.msk.bf16.vlgmr.msra.gmra.mxu3 %vm576_vm0, %v1558_v10  ;;  %v995_v46 = vld [vmem:[#allocation5 + $0x108] sm:$0xf]  ;;  %v1096_v47 = vld [vmem:[#allocation5 + $0x114] sm:$0xf0]  ;;  %v916_v49 = vor.u32 %v1076_v39, %v915_v38  ;;  %v1082_v53 = vld [vmem:[#allocation5 + $0xac] sm:$0xf]  ;;  %v1032_v55 = vor.u32 %v1102_v43, %v1029_v45 }
  0x53   : > { %654 = vmatpush.bf16.msrb.mxu3 %v1044_v15  ;;  %586 = vmatpush.bf16.msra.mxu0 %v876_v16  ;;  %v899_v51 = vld [vmem:[#allocation5 + $0x48] sm:$0xf]  ;;  %v1072_v52 = vld [vmem:[#allocation5 + $0x54] sm:$0xf0]  ;;  %v949_v54 = vld [vmem:[#allocation5 + $0xb8] sm:$0xf0]  ;;  %v996_v56 = vor.u32 %v1096_v47, %v995_v46 }
  0x54   : > { %614 = vmatpush.bf16.msra.mxu2 %v880_v21  ;;  %v1098_v57 = vld [vmem:[#allocation5 + $0x12c] sm:$0xf]  ;;  %v1013_v58 = vld [vmem:[#allocation5 + $0x138] sm:$0xf0]  ;;  %v900_v59 = vor.u32 %v1072_v52, %v899_v51  ;;  %v952_v60 = vor.u32 %v1082_v53, %v949_v54  ;;  %v883_v61 = vld [vmem:[#allocation5 + $0x28] sm:$0xf] }
  0x55   : > { %v1068_v62 = vld [vmem:[#allocation5 + $0x34] sm:$0xf0]  ;;  %v1078_v63 = vld [vmem:[#allocation5 + $0x8c] sm:$0xf]  ;;  %v933_v0 = vld [vmem:[#allocation5 + $0x98] sm:$0xf0]  ;;  %v1016_v1 = vor.u32 %v1098_v57, %v1013_v58 }
  0x56   : > { %638 = vmatpush.bf16.msrb.mxu1 %v948_v19  ;;  %v1094_v2 = vld [vmem:[#allocation5 + $0x10c] sm:$0xf]  ;;  %v997_v3 = vld [vmem:[#allocation5 + $0x118] sm:$0xf0]  ;;  %v884_v4 = vor.u32 %v1068_v62, %v883_v61  ;;  %v936_v5 = vor.u32 %v1078_v63, %v933_v0  ;;  %v867_v6 = vld [vmem:[#allocation5 + $0x8] sm:$0xf] }
  0x57   : > { %655 = vmatpush.bf16.msrb.mxu3 %v1028_v28  ;;  %587 = vmatpush.bf16.msra.mxu0 %v860_v32  ;;  %v1064_v7 = vld [vmem:[#allocation5 + $0x14] sm:$0xf0]  ;;  %v1074_v8 = vld [vmem:[#allocation5 + $0x6c] sm:$0xf]  ;;  %v917_v9 = vld [vmem:[#allocation5 + $0x78] sm:$0xf0]  ;;  %v1000_v11 = vor.u32 %v1094_v2, %v997_v3 }
  0x58   : > { %615 = vmatpush.bf16.msra.mxu2 %v864_v35  ;;  %v868_v12 = vor.u32 %v1064_v7, %v867_v6  ;;  %v920_v13 = vor.u32 %v1074_v8, %v917_v9  ;;  %v1070_v14 = vld [vmem:[#allocation5 + $0x4c] sm:$0xf]  ;;  %v901_v15 = vld [vmem:[#allocation5 + $0x58] sm:$0xf0]  ;;  %v317_v23 = vld [vmem:[#allocation7] sm:$0xf] }
  0x59   : > { %v904_v16 = vor.u32 %v1070_v14, %v901_v15  ;;  %v1066_v17 = vld [vmem:[#allocation5 + $0x2c] sm:$0xf]  ;;  %v885_v18 = vld [vmem:[#allocation5 + $0x38] sm:$0xf0]  ;;  %v319_v24 = vperm.slane %v317_v23, 0  ;;  %v320_v28 = vperm.slane %v317_v23, 1 }
  0x5a   : > { %639 = vmatpush.bf16.msrb.mxu1 %v932_v34  ;;  %588 = vmatmul.bf16.vlgmr.msra.gmra.mxu0 %v852_v48  ;;  %v888_v19 = vor.u32 %v1066_v17, %v885_v18  ;;  %v1062_v20 = vld [vmem:[#allocation5 + $0xc] sm:$0xf]  ;;  %v869_v21 = vld [vmem:[#allocation5 + $0x18] sm:$0xf0]  ;;  %v692_v31 = vld [vmem:[#allocation8] sm:$0xff]  ;;  %s1571_s26 = scalar_lea.vmem [#allocation10], %s848_s21 }
  0x5b   : > { %664 = vmatpush.bf16.msrb.mxu0 %v984_v36  ;;  %656 = vmatpush.bf16.msrb.mxu3 %v1012_v44  ;;  %v872_v22 = vor.u32 %v1062_v20, %v869_v21  ;;  %v693_v33 = vld [vmem:[#allocation8 + $0x8] sm:$0xff]  ;;  %v696_v45 = vld [vmem:[#allocation8 + $0x20] sm:$0xff]  ;;  %v694_v57 = vld [vmem:[#allocation8 + $0x10] sm:$0xff]  ;;  %s1109_s11 = sshll.u32 %s1448_s19, 5  ;;  %s729_s27 = sshll.u32 %s1571_s26, 4  ;;  %s730_s27 = int_to_ptr.vmem [resolvable:$true] %s729_s27 }
  0x5c   : > { %682 = vmatpush.bf16.msrb.mxu2 %v1048_v42  ;;  %v697_v46 = vld [vmem:[#allocation8 + $0x28] sm:$0xff]  ;;  %v695_v62 = vld [vmem:[#allocation8 + $0x18] sm:$0xff]  ;;  %s728_s20 = scalar_lea.hbm %s1615_s4, %s1109_s11  ;;  %v698_v8 = vld [vmem:[#allocation8 + $0x30] sm:$0xff]  ;;  %s717_s19 = scalar_lea.sflag [#allocation4], %s1538_s10 }
  0x5d   : > { %616 = vmatmul.bf16.vlgmr.msra.gmra.mxu2 %v852_v48  ;;  %s731_s28 = sshll.u32 %s728_s20, 4  ;;  %s1335_s9 = scalar_lea.hbm %s1615_s4, 64  ;;  %s732_s28 = int_to_ptr.hbm [resolvable:$true] %s731_s28 }
  0x5e   : > { %640 = vmatpush.bf16.msrb.mxu1 %v916_v49  ;;  %s1329_s6 = sshra.s32 %s732_s28, 4  ;;  %s1330_s6 = int_to_ptr.hbm [resolvable:$true] %s1329_s6 }
  0x5f   : > { %665 = vmatpush.bf16.msrb.mxu0 %v968_v50  ;;  %657 = vmatpush.bf16.msrb.mxu3 %v996_v56  ;;  %v321_v50 = vperm.slane %v317_v23, 2  ;;  %s1331_s7 = scalar_lea.hbm %s1330_s6, 32  ;;  %p1336_p11 = scmp.lt.s32.totalorder %s1330_s6, %s1615_s4 }
  0x60   : > { %683 = vmatpush.bf16.msrb.mxu2 %v1032_v55  ;;  %v322_v55 = vperm.slane %v317_v23, 3  ;;  %p1332_p1 = scmp.ne.s32.totalorder %s1330_s6, %s1331_s7  ;;  %p1337_p9 = scmp.lt.s32.totalorder %s1335_s9, %s1331_s7 }
  0x62   : > { %641 = vmatpush.bf16.msrb.mxu1 %v900_v59  ;;  %1051 = vmatmul.msk.bf16.vlgmr.msrb.gmra.mxu3 %vm576_vm0, %v1558_v10  ;;  %p1333_p4 = pnand %p1332_p1, %p1510_p7  ;;  %p1338_p2 = por %p1337_p9, %p1336_p11 }
  0x63   : > { %666 = vmatpush.bf16.msrb.mxu0 %v952_v60 }
  0x64   : > { %684 = vmatpush.bf16.msrb.mxu2 %v1016_v1  ;;  %p1334_p8 = pneg %p1333_p4 }
  0x66   : > { %642 = vmatpush.bf16.msrb.mxu1 %v884_v4  ;;  %p1339_p10 = pnand %p1338_p2, %p1334_p8 }
  0x67   : > { %667 = vmatpush.bf16.msrb.mxu0 %v936_v5 }
  0x68   : > { %685 = vmatpush.bf16.msrb.mxu2 %v1000_v11  ;;  %v699_v11 = vld [vmem:[#allocation8 + $0x38] sm:$0xff] }
  0x6a   : > { %643 = vmatpush.bf16.msrb.mxu1 %v868_v12 }
  0x6b   : > { %668 = vmatpush.bf16.msrb.mxu0 %v920_v13 }
  0x6d   : > { %644 = vmatmul.bf16.vlgmr.msrb.gmra.mxu1 %v852_v48  ;;  %1052 = vmatmul.msk.bf16.vlgmr.msrb.gmra.mxu2 %vm576_vm0, %v1558_v10 }
  0x6f   : > { %669 = vmatpush.bf16.msrb.mxu0 %v904_v16 }
  0x73   : > { %670 = vmatpush.bf16.msrb.mxu0 %v888_v19 }
  0x77   : > { %671 = vmatpush.bf16.msrb.mxu0 %v872_v22 }
  0x7a   : > { %672 = vmatmul.bf16.vlgmr.msrb.gmra.mxu0 %v852_v48 }
  0xca   : > { %v603_v26 = vpop.f32.mrf.mxu1 }
  0xd2   : > { %v605_v37 = vpop.f32.mrf.mxu1 }
  0xd5   : > { %v631_v29 = vpop.f32.mrf.mxu3 }
  0xd7   : > { %v589_v25 = vpop.f32.mrf.mxu0 }
  0xd8   : > { %v590_v27 = vadd.f32 %v589_v25, %v319_v24 }
  0xda   : > { %v604_v30 = vadd.f32 %v603_v26, %v590_v27 }
  0xdc   : > { %v700_v35 = vadd.f32 %v692_v31, %v604_v30 }
  0xdd   : > { %v633_v42 = vpop.f32.mrf.mxu3 }
  0xdf   : > { %v591_v34 = vpop.f32.mrf.mxu0 }
  0xe0   : > { %v617_v32 = vpop.f32.mrf.mxu2  ;;  %v592_v39 = vadd.f32 %v591_v34, %v319_v24 }
  0xe1   : > { %v618_v10 = vadd.f32 %v617_v32, %v320_v28 }
  0xe2   : > { %v606_v43 = vadd.f32 %v605_v37, %v592_v39 }
  0xe3   : > { %v632_v36 = vadd.f32 %v631_v29, %v618_v10 }
  0xe4   : > { %v704_v48 = vadd.f32 %v696_v45, %v606_v43 }
  0xe5   : > { %v701_v38 = vadd.f32 %v693_v33, %v632_v36  ;;  %v659_v54 = vpop.f32.mrf.mxu3 }
  0xe7   : > { %v708_v40 = vpack.c.bf16 %v701_v38, %v700_v35 }
  0xe8   : > { %v619_v41 = vpop.f32.mrf.mxu2 }
  0xe9   : > { %712 = vst [vmem:[%s1571_s26] sm:$0xff] %v708_v40  ;;  %v620_v44 = vadd.f32 %v619_v41, %v320_v28 }
  0xea   : > { %v645_v51 = vpop.f32.mrf.mxu1 }
  0xeb   : > { %v634_v47 = vadd.f32 %v633_v42, %v620_v44  ;;  %v646_v53 = vadd.f32 %v645_v51, %v321_v50 }
  0xed   : > { %v705_v49 = vadd.f32 %v697_v46, %v634_v47  ;;  %v660_v56 = vadd.f32 %v659_v54, %v646_v53  ;;  %v661_v3 = vpop.f32.mrf.mxu3 }
  0xef   : > { %v710_v52 = vpack.c.bf16 %v705_v49, %v704_v48  ;;  %v702_v63 = vadd.f32 %v694_v57, %v660_v56 }
  0xf0   : > { %v687_v58 = vpop.f32.mrf.mxu2 }
  0xf1   : > { %714 = vst [vmem:[%s1571_s26 + $0x10] sm:$0xff] %v710_v52 }
  0xf2   : > { %v647_v61 = vpop.f32.mrf.mxu1 }
  0xf3   : > { %v648_v1 = vadd.f32 %v647_v61, %v321_v50 }
  0xf5   : > { %v662_v6 = vadd.f32 %v661_v3, %v648_v1 }
  0xf7   : > { %v673_v59 = vpop.f32.mrf.mxu0  ;;  %v706_v13 = vadd.f32 %v698_v8, %v662_v6 }
  0xf8   : > { %v674_v60 = vadd.f32 %v673_v59, %v322_v55  ;;  %v689_v9 = vpop.f32.mrf.mxu2 }
  0xfa   : > { %v688_v0 = vadd.f32 %v687_v58, %v674_v60 }
  0xfc   : > { %v703_v2 = vadd.f32 %v695_v62, %v688_v0 }
  0xfe   : > { %v709_v4 = vpack.c.bf16 %v703_v2, %v702_v63 }
  0xff   : > { %v675_v5 = vpop.f32.mrf.mxu0 }
 0x100   : > { %713 = vst [vmem:[%s1571_s26 + $0x8] sm:$0xff] %v709_v4  ;;  %v676_v7 = vadd.f32 %v675_v5, %v322_v55 }
 0x102   : > { %v690_v12 = vadd.f32 %v689_v9, %v676_v7 }
 0x104   : > { %v707_v14 = vadd.f32 %v699_v11, %v690_v12 }
 0x106   : > { %v711_v15 = vpack.c.bf16 %v707_v14, %v706_v13 }
 0x108   : > { %715 = vst [vmem:[%s1571_s26 + $0x18] sm:$0xff] %v711_v15 }
 0x109   : > { %1342 = shalt.err (!%p1339_p10)
}
 0x10a   : > { %s1400_s10 = smov 256   ;;  %s1401_s24 = smov 16  }
 0x10b   : > { %1124 = dma.vmem_to_hbm [thread:$0]  (%p1510_p7), %s730_s27, 512, %s732_s28, %s717_s19, %s1400_s10, %s1400_s10, %s1401_s24  }
 0x10c PF: > { %s746_s21 = sand.u32 1, %s1377_s15   ;;  %p1622_p12 = scmp.ge.s32.totalorder %s1389_s18, 2 }
 0x10d   : > { %s747_s26 = scalar_lea.sflag [#allocation4], %s746_s21 }
 0x10e   : > { %p1141_p13 = pnand %p1622_p12, %p1462_p6 }
 0x110   : > { %p1142_p0 = pneg %p1141_p13 }
 0x112   : > { %1372 = dma.done.wait (%p1142_p0), %s747_s26, 512  }
 0x113   : > { %1374 = vsyncadd (%p1142_p0), %s747_s26, 4294966784  ;;  %p19_p3 = scmp.ge.s32.totalorder %s1496_s25, 4   ;;  %s1623_s15 = smov %s1381_s16 }
 0x114   : > { %s1624_s16 = smov %s1385_s17  ;;  %s1625_s17 = smov %s1506_s30 }
 0x115   : > { %s1626_s18 = smov %s1496_s25  ;;  %21 = sbr.rel (!%p19_p3) target bundleno = 7 (0x7), region = 93 }
 0x11a   :  { %753 = vsyncpa [#allocation3], 1 }
 0x11b   :  { %755 = vsyncpa [#allocation3 + $0x1], 1 }
 0x11c   :  { %756 = vsyncpa [#allocation6], 1 }
 0x11d   :  { %757 = vsyncpa [#allocation9], 1 }
 0x11e   :  { %758 = vsyncpa [#allocation4], 1 }
 0x11f   :  { %760 = vsyncpa [#allocation4 + $0x1], 1 }

</bundles_post_ra>
